<compile_context>
chip_gen: v7x
topology: tpu7x:2x2x1
jax: 0.10.0
libtpu: 0.0.40
codegen_flags: <defaults>
</compile_context>

<pallas_src>
import jax
import jax.numpy as jnp
from jax.experimental import pallas as pl
from jax.experimental.pallas import tpu as pltpu

LANE = 128   # vreg lane width
SUB = 8      # f32 sublane width


def _round_up(x, m):
    return ((x + m - 1) // m) * m


# ---------------------------------------------------------------------------
# Parameter fusion + packing (done once at construction time)
# ---------------------------------------------------------------------------
def _fuse_twin_params(params_q1, params_q2):
    """Fuse the two Q-nets layer-by-layer.

    Layer 0: concat weights along the output axis ([D_in, H] + [D_in, H] ->
    [D_in, 2H]).  Deeper layers: block-diagonal, so the two hidden paths stay
    independent while sharing one matmul.
    """
    fused = []
    for i, ((w1, b1), (w2, b2)) in enumerate(zip(params_q1, params_q2)):
        if i == 0:
            w = jnp.concatenate([w1, w2], axis=1)
        else:
            z12 = jnp.zeros((w1.shape[0], w2.shape[1]), jnp.float32)
            z21 = jnp.zeros((w2.shape[0], w1.shape[1]), jnp.float32)
            w = jnp.concatenate(
                [jnp.concatenate([w1, z12], axis=1),
                 jnp.concatenate([z21, w2], axis=1)], axis=0)
        b = jnp.concatenate([b1, b2], axis=0)
        fused.append((w, b))
    return fused


def _build_packed_critic(params_q1, params_q2, input_dims):
    """Pack all fused weights/biases into one zero-padded [R, w_pad] slab."""
    fused = _fuse_twin_params(params_q1, params_q2)
    n_layers = len(fused)
    out_dims = [int(w.shape[1]) for w, _ in fused]
    w_pad = max(LANE, _round_up(max(out_dims), LANE))

    # Row layout: every sub-block starts at an 8-aligned sublane offset.
    split_offs = []
    cur = 0
    for d in input_dims:                 # layer-0 weight rows, split per input
        split_offs.append(cur)
        cur += _round_up(d, SUB)
    b0_off = cur                         # layer-0 bias (row 0 of an 8-row block)
    cur += SUB
    deeper = []
    for _ in range(1, n_layers):         # deeper layers: [w_pad, w_pad] weight + bias
        w_off = cur
        cur += w_pad
        b_off = cur
        cur += SUB
        deeper.append((w_off, b_off))
    total_rows = cur

    slab = jnp.zeros((total_rows, w_pad), jnp.float32)
    w0, b0 = fused[0]
    r = 0
    for off, d in zip(split_offs, input_dims):
        slab = slab.at[off:off + d, :w0.shape[1]].set(w0[r:r + d, :])
        r += d
    slab = slab.at[b0_off, :b0.shape[0]].set(b0)
    for i, (w_off, b_off) in enumerate(deeper, start=1):
        w, b = fused[i]
        slab = slab.at[w_off:w_off + w.shape[0], :w.shape[1]].set(w)
        slab = slab.at[b_off, :b.shape[0]].set(b)

    meta = dict(
        input_dims=tuple(int(d) for d in input_dims),
        split_offs=tuple(split_offs),
        b0_off=b0_off,
        deeper=tuple(deeper),
        w_pad=w_pad,
        n_layers=n_layers,
        total_rows=total_rows,
        fused_dims=tuple((int(w.shape[0]), int(w.shape[1])) for w, _ in fused),
    )
    return slab, meta


# ---------------------------------------------------------------------------
# Pallas kernel: fused twin-Q MLP (all layers, both nets, one call)
# ---------------------------------------------------------------------------
def _make_fused_kernel(meta):
    input_dims = meta["input_dims"]
    split_offs = meta["split_offs"]
    b0_off = meta["b0_off"]
    deeper = meta["deeper"]
    w_pad = meta["w_pad"]
    n_layers = meta["n_layers"]
    n_in = len(input_dims)

    def kernel(*refs):
        in_refs = refs[:n_in]
        w_ref = refs[n_in]
        out_ref = refs[n_in + 1]

        # Layer 0: sum of per-input matmuls against static row-splits of the
        # fused W0, plus the fused bias row (no wrapper-side concat needed).
        h = None
        for x_ref, d, off in zip(in_refs, input_dims, split_offs):
            part = jnp.dot(x_ref[...], w_ref[off:off + d, :],
                           preferred_element_type=jnp.float32)
            h = part if h is None else h + part
        h = h + w_ref[b0_off:b0_off + 1, :]
        if n_layers > 1:
            h = jnp.maximum(h, 0.0)                       # ReLU

        # Remaining layers: zero-padded [w_pad, w_pad] fused weights; padding
        # rows/cols are exactly zero so results are unaffected.
        for i, (w_off, b_off) in enumerate(deeper, start=1):
            h = jnp.dot(h, w_ref[w_off:w_off + w_pad, :],
                        preferred_element_type=jnp.float32)
            h = h + w_ref[b_off:b_off + 1, :]
            if i < n_layers - 1:
                h = jnp.maximum(h, 0.0)                   # ReLU

        # Lane-dense store: full [block_b, w_pad] slab (q1 = lane 0, q2 = lane 1).
        out_ref[...] = jnp.tanh(h)

    return kernel


def _fused_forward(inputs, slab, meta):
    """Run both Q-nets for a batch; returns a [B, w_pad] slab (q1/q2 in lanes 0/1)."""
    input_dims = meta["input_dims"]
    w_pad = meta["w_pad"]
    total_rows = meta["total_rows"]
    B = inputs[0].shape[0]

    block_b = min(512, _round_up(B, SUB))
    b_pad = _round_up(B, block_b)
    if b_pad != B:
        inputs = [jnp.pad(x, ((0, b_pad - B), (0, 0))) for x in inputs]
    grid = (b_pad // block_b,)

    in_specs = [pl.BlockSpec((block_b, d), lambda i: (i, 0)) for d in input_dims]
    # Weight slab: identical (full) block every grid step -> VMEM-resident.
    in_specs.append(pl.BlockSpec((total_rows, w_pad), lambda i: (0, 0)))
    out_spec = pl.BlockSpec((block_b, w_pad), lambda i: (i, 0))

    flops = 2 * b_pad * sum(din * dout for din, dout in meta["fused_dims"])
    cost = pl.CostEstimate(
        flops=flops,
        transcendentals=b_pad * w_pad,
        bytes_accessed=4 * (b_pad * (sum(input_dims) + w_pad) + total_rows * w_pad),
    )

    out = pl.pallas_call(
        _make_fused_kernel(meta),
        out_shape=jax.ShapeDtypeStruct((b_pad, w_pad), jnp.float32),
        grid=grid,
        in_specs=in_specs,
        out_specs=out_spec,
        compiler_params=pltpu.CompilerParams(
            dimension_semantics=("parallel",)),
        cost_estimate=cost,
    )(*inputs, slab)

    if b_pad != B:
        out = out[:B]
    return out


# ---------------------------------------------------------------------------
# Critic module (parameter init + forward glue)
# ---------------------------------------------------------------------------
def init_ff_network(key, hidden_layers, input_dim, output_dim):
    """PyTorch-Linear-shaped init (weights stored transposed: [in, out])."""
    dims = [input_dim] + list(hidden_layers) + [output_dim]
    params = []
    for i in range(len(dims) - 1):
        fan_in, fan_out = dims[i], dims[i + 1]
        key, kw, kb = jax.random.split(key, 3)
        bound = 1.0 / jnp.sqrt(fan_in)
        w = jax.random.uniform(kw, (fan_in, fan_out), jnp.float32, -bound, bound)
        b = jax.random.uniform(kb, (fan_out,), jnp.float32, -bound, bound)
        params.append((w, b))
    return params


class CriticPallas:
    def __init__(self, key, hidden_layers, state_dim, action_dim, context_size=0):
        k1, k2 = jax.random.split(key)
        in_dim = state_dim + action_dim + context_size
        self.params_q1 = init_ff_network(k1, hidden_layers, in_dim, 1)
        self.params_q2 = init_ff_network(k2, hidden_layers, in_dim, 1)
        input_dims = [state_dim, action_dim]
        if context_size > 0:
            input_dims.append(context_size)
        # Fuse + pack once; reused by every forward call (single DMA per call).
        self.slab, self.meta = _build_packed_critic(
            self.params_q1, self.params_q2, input_dims)

    def _q_both(self, state, action, context=None):
        inputs = [state, action]
        if context is not None:
            inputs.append(context)
        inputs = [x if x.dtype == jnp.float32 else x.astype(jnp.float32)
                  for x in inputs]
        out = _fused_forward(inputs, self.slab, self.meta)
        return out[:, 0:1], out[:, 1:2]

    def Q_val(self, state, action, net, context=None):
        q1, q2 = self._q_both(state, action, context)
        return q1 if net == 1 else q2

    def forward(self, state, action, context=None, which='both'):
        q1, q2 = self._q_both(state, action, context)
        if which == 'Q1':
            return q1
        elif which == 'both':
            return (q1, q2)
        # NOTE: mirrors the PyTorch module, which returns None for other `which`.


# ---------------------------------------------------------------------------
# Pure-JAX reference for correctness check
# ---------------------------------------------------------------------------
def _mlp_ref(x, params):
    h = x
    for i, (w, b) in enumerate(params):
        h = h @ w + b
        if i < len(params) - 1:
            h = jnp.maximum(h, 0.0)
    return jnp.tanh(h)


if __name__ == "__main__":
    key = jax.random.PRNGKey(0)
    k_params, k_params_c, k_state, k_action, k_ctx = jax.random.split(key, 5)

    batch = 8
    state_dim = 12
    action_dim = 4
    hidden_layers = [32, 32]

    state = jax.random.normal(k_state, (batch, state_dim), jnp.float32)
    action = jax.random.normal(k_action, (batch, action_dim), jnp.float32)

    # --- Critic without context --------------------------------------------
    critic = CriticPallas(k_params, hidden_layers, state_dim, action_dim,
                          context_size=0)
    q1, q2 = critic.forward(state, action, which='both')
    q1 = jax.block_until_ready(q1)
    q2 = jax.block_until_ready(q2)

    x = jnp.concatenate([state, action], axis=1)
    q1_ref = _mlp_ref(x, critic.params_q1)
    q2_ref = _mlp_ref(x, critic.params_q2)
    assert q1.shape == (batch, 1) and q2.shape == (batch, 1)
    assert jnp.allclose(q1, q1_ref, atol=1e-5, rtol=1e-5)
    assert jnp.allclose(q2, q2_ref, atol=1e-5, rtol=1e-5)

    # which='Q1' path
    q1_only = jax.block_until_ready(critic.forward(state, action, which='Q1'))
    assert jnp.allclose(q1_only, q1_ref, atol=1e-5, rtol=1e-5)

    # --- Critic with context ------------------------------------------------
    context_size = 6
    critic_c = CriticPallas(k_params_c, hidden_layers, state_dim, action_dim,
                            context_size=context_size)
    ctx = jax.random.normal(k_ctx, (batch, context_size), jnp.float32)
    qc1, qc2 = critic_c.forward(state, action, context=ctx, which='both')
    qc1 = jax.block_until_ready(qc1)
    qc2 = jax.block_until_ready(qc2)

    xc = jnp.concatenate([state, action, ctx], axis=1)
    qc1_ref = _mlp_ref(xc, critic_c.params_q1)
    qc2_ref = _mlp_ref(xc, critic_c.params_q2)
    assert jnp.allclose(qc1, qc1_ref, atol=1e-5, rtol=1e-5)
    assert jnp.allclose(qc2, qc2_ref, atol=1e-5, rtol=1e-5)

    print("KERNEL_OK")
</pallas_src>

<mosaic_0001>
module attributes {stable_mosaic.version = 11 : i64} {
  func.func @kernel(%arg0: i32, %arg1: memref<8x12xf32, #tpu.memory_space<vmem>>, %arg2: memref<8x4xf32, #tpu.memory_space<vmem>>, %arg3: memref<304x128xf32, #tpu.memory_space<vmem>>, %arg4: memref<8x128xf32, #tpu.memory_space<vmem>>) attributes {dimension_semantics = [#tpu.dimension_semantics<parallel>], iteration_bounds = array<i64: 1>, scalar_prefetch = 0 : i64, scratch_operands = 0 : i64, tpu.core_type = #tpu.core_type<tc>, window_params = [{transform_indices = @transform_0, window_bounds = array<i64: 8, 12>}, {transform_indices = @transform_1, window_bounds = array<i64: 8, 4>}, {pipeline_mode = #tpu.pipeline_mode<synchronous>, transform_indices = @transform_2, window_bounds = array<i64: 304, 128>}, {transform_indices = @transform_3, window_bounds = array<i64: 8, 128>}]} {
    %c0 = arith.constant 0 : index
    %c0_0 = arith.constant 0 : index
    %0 = vector.load %arg1[%c0, %c0_0] : memref<8x12xf32, #tpu.memory_space<vmem>>, vector<8x12xf32>
    %c0_1 = arith.constant 0 : index
    %c0_2 = arith.constant 0 : index
    %1 = vector.load %arg3[%c0_1, %c0_2] : memref<304x128xf32, #tpu.memory_space<vmem>>, vector<12x128xf32>
    %cst = arith.constant dense<0.000000e+00> : vector<8x128xf32>
    %2 = tpu.matmul %0, %1, %cst {dimension_numbers = #tpu.dot_dimension_numbers<[1], [0], [0], [1], [0, 0, 1, 1], [], []>} : vector<8x12xf32>, vector<12x128xf32>, vector<8x128xf32> -> vector<8x128xf32>
    %c0_3 = arith.constant 0 : index
    %c0_4 = arith.constant 0 : index
    %3 = vector.load %arg2[%c0_3, %c0_4] : memref<8x4xf32, #tpu.memory_space<vmem>>, vector<8x4xf32>
    %c16 = arith.constant 16 : index
    %c0_5 = arith.constant 0 : index
    %4 = vector.load %arg3[%c16, %c0_5] : memref<304x128xf32, #tpu.memory_space<vmem>>, vector<4x128xf32>
    %cst_6 = arith.constant dense<0.000000e+00> : vector<8x128xf32>
    %5 = tpu.matmul %3, %4, %cst_6 {dimension_numbers = #tpu.dot_dimension_numbers<[1], [0], [0], [1], [0, 0, 1, 1], [], []>} : vector<8x4xf32>, vector<4x128xf32>, vector<8x128xf32> -> vector<8x128xf32>
    %6 = arith.addf %2, %5 : vector<8x128xf32>
    %c24 = arith.constant 24 : index
    %c0_7 = arith.constant 0 : index
    %7 = vector.load %arg3[%c24, %c0_7] : memref<304x128xf32, #tpu.memory_space<vmem>>, vector<1x128xf32>
    %8 = vector.broadcast %7 : vector<1x128xf32> to vector<8x128xf32>
    %9 = arith.addf %6, %8 : vector<8x128xf32>
    %cst_8 = arith.constant 0.000000e+00 : f32
    %10 = vector.broadcast %cst_8 : f32 to vector<8x128xf32>
    %11 = arith.maximumf %9, %10 : vector<8x128xf32>
    %c32 = arith.constant 32 : index
    %c0_9 = arith.constant 0 : index
    %12 = vector.load %arg3[%c32, %c0_9] : memref<304x128xf32, #tpu.memory_space<vmem>>, vector<128x128xf32>
    %cst_10 = arith.constant dense<0.000000e+00> : vector<8x128xf32>
    %13 = tpu.matmul %11, %12, %cst_10 {dimension_numbers = #tpu.dot_dimension_numbers<[1], [0], [0], [1], [0, 0, 1, 1], [], []>} : vector<8x128xf32>, vector<128x128xf32>, vector<8x128xf32> -> vector<8x128xf32>
    %c160 = arith.constant 160 : index
    %c0_11 = arith.constant 0 : index
    %14 = vector.load %arg3[%c160, %c0_11] : memref<304x128xf32, #tpu.memory_space<vmem>>, vector<1x128xf32>
    %15 = vector.broadcast %14 : vector<1x128xf32> to vector<8x128xf32>
    %16 = arith.addf %13, %15 : vector<8x128xf32>
    %cst_12 = arith.constant 0.000000e+00 : f32
    %17 = vector.broadcast %cst_12 : f32 to vector<8x128xf32>
    %18 = arith.maximumf %16, %17 : vector<8x128xf32>
    %c168 = arith.constant 168 : index
    %c0_13 = arith.constant 0 : index
    %19 = vector.load %arg3[%c168, %c0_13] : memref<304x128xf32, #tpu.memory_space<vmem>>, vector<128x128xf32>
    %cst_14 = arith.constant dense<0.000000e+00> : vector<8x128xf32>
    %20 = tpu.matmul %18, %19, %cst_14 {dimension_numbers = #tpu.dot_dimension_numbers<[1], [0], [0], [1], [0, 0, 1, 1], [], []>} : vector<8x128xf32>, vector<128x128xf32>, vector<8x128xf32> -> vector<8x128xf32>
    %c296 = arith.constant 296 : index
    %c0_15 = arith.constant 0 : index
    %21 = vector.load %arg3[%c296, %c0_15] : memref<304x128xf32, #tpu.memory_space<vmem>>, vector<1x128xf32>
    %22 = vector.broadcast %21 : vector<1x128xf32> to vector<8x128xf32>
    %23 = arith.addf %20, %22 : vector<8x128xf32>
    %24 = math.tanh %23 : vector<8x128xf32>
    %c0_16 = arith.constant 0 : index
    %c0_17 = arith.constant 0 : index
    %25 = vector.load %arg4[%c0_16, %c0_17] : memref<8x128xf32, #tpu.memory_space<vmem>>, vector<8x128xf32>
    tpu.vector_store %arg4[%c0_16, %c0_17], %24 {strides = array<i32>} : memref<8x128xf32, #tpu.memory_space<vmem>>, vector<8x128xf32>,
    return
  }
  func.func @transform_0(%arg0: i32) -> (i32, i32) {
    %c0_i32 = arith.constant 0 : i32
    %c0_i32_0 = arith.constant 0 : i32
    return %arg0, %c0_i32 : i32, i32
  }
  func.func @transform_1(%arg0: i32) -> (i32, i32) {
    %c0_i32 = arith.constant 0 : i32
    %c0_i32_0 = arith.constant 0 : i32
    return %arg0, %c0_i32 : i32, i32
  }
  func.func @transform_2(%arg0: i32) -> (i32, i32) {
    %c0_i32 = arith.constant 0 : i32
    %c0_i32_0 = arith.constant 0 : i32
    %c0_i32_1 = arith.constant 0 : i32
    return %c0_i32, %c0_i32_0 : i32, i32
  }
  func.func @transform_3(%arg0: i32) -> (i32, i32) {
    %c0_i32 = arith.constant 0 : i32
    %c0_i32_0 = arith.constant 0 : i32
    return %arg0, %c0_i32 : i32, i32
  }
}

</mosaic_0001>

<bundles_post_ra>
// kernel: tpu_custom_call.1
= control target key start
LH: loop header
LB: loop body
LE: loop exit
PB: predicated region body
PF: predicated region fallthrough
CT: control target
= control target key end

     0   :  { %8 = vsyncpa [#allocation3], 0  ;;  %s713_s0 = inlined_call_operand.vmem [shape: f32[8,12], index: 0, kind: input, shape index: {}]   ;;  %s714_s1 = inlined_call_operand.vmem [shape: f32[8,4], index: 1, kind: input, shape index: {}]   ;;  %s715_s2 = inlined_call_operand.hbm [shape: f32[304,128], index: 2, kind: input, shape index: {}]   ;;  %s716_s3 = inlined_call_operand.hbm [shape: f32[8,128], index: 3, kind: output, shape index: {}]  }
   0x1   :  { %9 = vsyncpa [#allocation4], 0  ;;  %s634_s12 = smov [#allocation2]   ;;  %s586_s16 = scalar_lea.hbm %s715_s2, 4864 }
   0x2   :  { %s19_s13 = sshll.u32 %s634_s12, 4  ;;  %p587_p0 = scmp.ne.s32.totalorder %s715_s2, %s586_s16  ;;  %s20_s13 = int_to_ptr.vmem [resolvable:$true] %s19_s13 }
   0x3   :  { %p590_p1 = scmp.lt.u32.totalorder %s586_s16, %s715_s2 }
   0x5   :  { %p592_p2 = pnand %p590_p1, %p587_p0 }
   0x7   :  { %595 = shalt.err (!%p592_p2)
}
   0x8   :  { %s596_s21 = scalar_lea.vmem %s20_s13, 4864  ;;  %p601_p4 = scmp.lt.s32.totalorder %s20_s13, %s20_s13 }
   0x9   :  { %p597_p3 = scmp.ne.s32.totalorder %s20_s13, %s596_s21  ;;  %p602_p5 = scmp.lt.s32.totalorder %s596_s21, %s596_s21 }
   0xb   :  { %p603_p6 = por %p602_p5, %p601_p4 }
   0xd   :  { %p604_p7 = pnand %p603_p6, %p597_p3 }
   0xf   :  { %607 = shalt.err (!%p604_p7)
}
  0x10   :  { %s635_s22 = smov 128   ;;  %s636_s23 = smov 8  }
  0x11   :  { %25 = dma.hbm_to_vmem [thread:$0]  %s715_s2, 4864, %s20_s13, [#allocation3], %s635_s22, %s635_s22, %s636_s23  }
  0x12   :  { %630 = dma.done.wait [#allocation3], 4864  }
  0x13   :  { %631 = vsyncadd [#allocation3], 4294962432  ;;  %v637_v0 = vmov 0.0|0.0   ;;  %v638_v1 = vmov 0.0   ;;  %vm639_vm0 = vmmov 0   ;;  %vm38_vm1 = vcmask 1043456  }
  0x14   :  { %524 = vmatprep.subr.bf16.mxu1 %v637_v0  ;;  %442 = vmatprep.subr.mxu0 %v638_v1  ;;  %vm640_vm2 = vmmov 1   ;;  %vm34_vm4 = vcmask 31744   ;;  %v30_v2 = vld [vmem:[#allocation2] sm:$0xff]  ;;  %v31_v3 = vld [vmem:[#allocation2 + $0x8] sm:$0xf]  ;;  %v198_v9 = vld [vmem:[#allocation2 + $0x30] sm:$0xff] }
  0x15   :  { %444 = vmatprep.mubr.msk.f32.mxu0 %vm639_vm0, %v638_v1  ;;  %451 = vmatprep.mubr.msk.f32.mxu1 %vm639_vm0, %v638_v1  ;;  %vm526_vm3 = vmpackc.low %vm38_vm1, %vm640_vm2  ;;  %v33_v4 = vld [vmem:[#allocation2 + $0x10] sm:$0xf]  ;;  %v525_v5 = vpack.c.bf16 %v31_v3, %v30_v2  ;;  %v32_v6 = vld [vmem:[%s714_s1] sm:$0xff]  ;;  %vm112_vm5 = vcmask 97280  }
  0x16   :  { %443 = vmatpush3.msk.msra.mxu0 %vm38_vm1, %v33_v4  ;;  %v196_v7 = vld [vmem:[#allocation2 + $0x20] sm:$0xff]  ;;  %v197_v8 = vld [vmem:[#allocation2 + $0x28] sm:$0xff]  ;;  %v199_v10 = vld [vmem:[#allocation2 + $0x38] sm:$0xff] }
  0x17   :  { %445 = vmatmul.mubr.msk.f32.vlgmr.msra.gmra.mrb[0].mxu0 %vm34_vm4, %v32_v6  ;;  %528 = vmatprep.subr.bf16.mxu0 %v637_v0  ;;  %v29_v11 = vld [vmem:[%s713_s0] sm:$0xff]  ;;  %v529_v12 = vpack.c.bf16 %v197_v8, %v196_v7  ;;  %v532_v13 = vpack.c.bf16 %v199_v10, %v198_v9  ;;  %v201_v15 = vld [vmem:[#allocation2 + $0x48] sm:$0xff]  ;;  %v202_v17 = vld [vmem:[#allocation2 + $0x50] sm:$0xff]  ;;  %s641_s0 = smov [#allocation5]  }
  0x18   :  { %527 = vmatpush3.bf16.msk.msra.mxu1 %vm526_vm3, %v525_v5  ;;  %486 = vmatprep.mubr.msk.f32.mxu0 %vm639_vm0, %v638_v1  ;;  %v200_v14 = vld [vmem:[#allocation2 + $0x40] sm:$0xff]  ;;  %v203_v18 = vld [vmem:[#allocation2 + $0x58] sm:$0xff]  ;;  %v205_v21 = vld [vmem:[#allocation2 + $0x68] sm:$0xff]  ;;  %s387_s1 = sshll.u32 %s641_s0, 4  ;;  %s388_s1 = int_to_ptr.vmem [resolvable:$true] %s387_s1 }
  0x19   :  { %552 = vmatprep.subr.bf16.mxu1 %v637_v0  ;;  %530 = vmatpush3.bf16.msra.mxu0 %v529_v12  ;;  %v535_v16 = vpack.c.bf16 %v201_v15, %v200_v14  ;;  %v538_v19 = vpack.c.bf16 %v203_v18, %v202_v17  ;;  %v204_v20 = vld [vmem:[#allocation2 + $0x60] sm:$0xff]  ;;  %v206_v23 = vld [vmem:[#allocation2 + $0x70] sm:$0xff]  ;;  %v207_v24 = vld [vmem:[#allocation2 + $0x78] sm:$0xff]  ;;  %s608_s29 = scalar_lea.vmem %s388_s1, 128  ;;  %p613_p9 = scmp.lt.s32.totalorder %s388_s1, %s388_s1 }
  0x1a   :  { %531 = vmatprep.subr.bf16.mxu0 %v637_v0  ;;  %v541_v22 = vpack.c.bf16 %v205_v21, %v204_v20  ;;  %v544_v25 = vpack.c.bf16 %v207_v24, %v206_v23  ;;  %v208_v26 = vld [vmem:[#allocation2 + $0x80] sm:$0xff]  ;;  %v209_v27 = vld [vmem:[#allocation2 + $0x88] sm:$0xff]  ;;  %v210_v29 = vld [vmem:[#allocation2 + $0x90] sm:$0xff]  ;;  %p609_p8 = scmp.ne.s32.totalorder %s388_s1, %s608_s29  ;;  %p614_p10 = scmp.lt.s32.totalorder %s608_s29, %s608_s29 }
  0x1b   :  { %452 = vmatmul.mubr.msk.f32.vlgmr.msra.gmra.mrb[0].mxu1 %vm112_vm5, %v29_v11  ;;  %v547_v28 = vpack.c.bf16 %v209_v27, %v208_v26  ;;  %v211_v30 = vld [vmem:[#allocation2 + $0x98] sm:$0xff]  ;;  %v288_v32 = vld [vmem:[#allocation2 + $0xa8] sm:$0xff]  ;;  %v289_v33 = vld [vmem:[#allocation2 + $0xb0] sm:$0xff] }
  0x1c   :  { %521 = vmatprep.mubr.msk.f32.mxu1 %vm639_vm0, %v638_v1  ;;  %v550_v31 = vpack.c.bf16 %v211_v30, %v210_v29  ;;  %v290_v34 = vld [vmem:[#allocation2 + $0xb8] sm:$0xff]  ;;  %v553_v35 = vpack.c.bf16 %v289_v33, %v288_v32  ;;  %v291_v36 = vld [vmem:[#allocation2 + $0xc0] sm:$0xff]  ;;  %v292_v38 = vld [vmem:[#allocation2 + $0xc8] sm:$0xff]  ;;  %p615_p11 = por %p614_p10, %p613_p9 }
  0x1d   :  { %533 = vmatpush3.bf16.msra.mxu0 %v532_v13  ;;  %v556_v37 = vpack.c.bf16 %v291_v36, %v290_v34  ;;  %v293_v39 = vld [vmem:[#allocation2 + $0xd0] sm:$0xff]  ;;  %v294_v41 = vld [vmem:[#allocation2 + $0xd8] sm:$0xff]  ;;  %v295_v42 = vld [vmem:[#allocation2 + $0xe0] sm:$0xff] }
  0x1e   :  { %534 = vmatprep.subr.bf16.mxu0 %v637_v0  ;;  %554 = vmatpush3.bf16.msra.mxu1 %v553_v35  ;;  %v559_v40 = vpack.c.bf16 %v293_v39, %v292_v38  ;;  %v562_v43 = vpack.c.bf16 %v295_v42, %v294_v41  ;;  %v296_v44 = vld [vmem:[#allocation2 + $0xe8] sm:$0xff]  ;;  %v297_v45 = vld [vmem:[#allocation2 + $0xf0] sm:$0xff]  ;;  %v298_v47 = vld [vmem:[#allocation2 + $0xf8] sm:$0xff]  ;;  %p616_p12 = pnand %p615_p11, %p609_p8 }
  0x1f   :  { %555 = vmatprep.subr.bf16.mxu1 %v637_v0  ;;  %v565_v46 = vpack.c.bf16 %v297_v45, %v296_v44  ;;  %v299_v48 = vld [vmem:[#allocation2 + $0x100] sm:$0xff]  ;;  %v300_v50 = vld [vmem:[#allocation2 + $0x108] sm:$0xff]  ;;  %v301_v51 = vld [vmem:[#allocation2 + $0x110] sm:$0xff] }
  0x20   :  { %v568_v49 = vpack.c.bf16 %v299_v48, %v298_v47  ;;  %v571_v52 = vpack.c.bf16 %v301_v51, %v300_v50  ;;  %v400_v56 = vld [vmem:[#allocation2 + $0x18] ss:$0 sm:$0xff]  ;;  %v303_v62 = vld [vmem:[#allocation2 + $0x120] sm:$0xff] }
  0x21   :  { %536 = vmatpush3.bf16.msra.mxu0 %v535_v16  ;;  %v302_v61 = vld [vmem:[#allocation2 + $0x118] sm:$0xff]  ;;  %v401_v1 = vld [vmem:[#allocation2 + $0xa0] ss:$0 sm:$0xff] }
  0x22   :  { %537 = vmatprep.subr.bf16.mxu0 %v637_v0  ;;  %557 = vmatpush3.bf16.msra.mxu1 %v556_v37  ;;  %v574_v63 = vpack.c.bf16 %v303_v62, %v302_v61 }
  0x23   :  { %558 = vmatprep.subr.bf16.mxu1 %v637_v0 }
  0x25   :  { %539 = vmatpush3.bf16.msra.mxu0 %v538_v19 }
  0x26   :  { %540 = vmatprep.subr.bf16.mxu0 %v637_v0  ;;  %560 = vmatpush3.bf16.msra.mxu1 %v559_v40 }
  0x27   :  { %561 = vmatprep.subr.bf16.mxu1 %v637_v0 }
  0x29   :  { %542 = vmatpush3.bf16.msra.mxu0 %v541_v22 }
  0x2a   :  { %543 = vmatprep.subr.bf16.mxu0 %v637_v0  ;;  %563 = vmatpush3.bf16.msra.mxu1 %v562_v43 }
  0x2b   :  { %564 = vmatprep.subr.bf16.mxu1 %v637_v0 }
  0x2d   :  { %545 = vmatpush3.bf16.msra.mxu0 %v544_v25 }
  0x2e   :  { %546 = vmatprep.subr.bf16.mxu0 %v637_v0  ;;  %566 = vmatpush3.bf16.msra.mxu1 %v565_v46 }
  0x2f   :  { %567 = vmatprep.subr.bf16.mxu1 %v637_v0 }
  0x31   :  { %548 = vmatpush3.bf16.msra.mxu0 %v547_v28 }
  0x32   :  { %549 = vmatprep.subr.bf16.mxu0 %v637_v0  ;;  %569 = vmatpush3.bf16.msra.mxu1 %v568_v49 }
  0x33   :  { %570 = vmatprep.subr.bf16.mxu1 %v637_v0 }
  0x35   :  { %551 = vmatpush3.bf16.msra.mxu0 %v550_v31 }
  0x36   :  { %572 = vmatpush3.bf16.msra.mxu1 %v571_v52 }
  0x37   :  { %573 = vmatprep.subr.bf16.mxu1 %v637_v0  ;;  %v402_v0 = vld [vmem:[#allocation2 + $0x128] ss:$0 sm:$0xff] }
  0x3a   :  { %575 = vmatpush3.bf16.msra.mxu1 %v574_v63 }
  0xea   :  { %v108_v53 = vpop.f32.mrb[0].mxu0 }
  0xeb   :  { %v446_v54 = vpop.f32.mrb[1].mxu0 }
  0xee   :  { %v185_v55 = vpop.f32.mrb[0].mxu1 }
  0xef   :  { %v186_v57 = vadd.f32 %v185_v55, %v108_v53  ;;  %v453_v58 = vpop.f32.mrb[1].mxu1 }
  0xf1   :  { %v194_v59 = vadd.f32 %v400_v56, %v186_v57 }
  0xf3   :  { %v195_v60 = vmax.f32 %v194_v59, 0.0 }
  0xf5   :  { %487 = vmatmul.mubr.f32.vlgmr.msra.gmra.mrb[2].mxu0 %v195_v60 }
 0x1c8   :  { %v283_v2 = vpop.f32.mrb[2].mxu0 }
 0x1c9   :  { %v284_v3 = vadd.f32 %v401_v1, %v283_v2  ;;  %v488_v4 = vpop.f32.mrb[3].mxu0 }
 0x1cb   :  { %v287_v5 = vmax.f32 %v284_v3, 0.0 }
 0x1cd   :  { %522 = vmatmul.mubr.f32.vlgmr.msra.gmra.mrb[2].mxu1 %v287_v5 }
 0x2a0   :  { %v375_v6 = vpop.f32.mrb[2].mxu1 }
 0x2a1   :  { %v376_v7 = vadd.f32 %v402_v0, %v375_v6  ;;  %v523_v8 = vpop.f32.mrb[3].mxu1 }
 0x2a3   :  { %584 = vtanh.f32 %v376_v7 }
 0x2ad   :  { %v585_v9 = vpop.eup %584 }
 0x2ae   :  { %380 = vst [vmem:[#allocation5] sm:$0xff] %v585_v9 }
 0x2af   :  { %619 = shalt.err (!%p616_p12)
}
 0x2b0   :  { %s620_s5 = scalar_lea.hbm %s716_s3, 128 }
 0x2b1   :  { %p621_p13 = scmp.ne.s32.totalorder %s716_s3, %s620_s5  ;;  %p624_p0 = scmp.lt.u32.totalorder %s620_s5, %s716_s3 }
 0x2b3   :  { %p626_p1 = pnand %p624_p0, %p621_p13 }
 0x2b5   :  { %629 = shalt.err (!%p626_p1)
}
 0x2b6   :  { %390 = dma.vmem_to_hbm [thread:$0]  %s388_s1, 128, %s716_s3, [#allocation4]  }
 0x2b7   :  { %632 = dma.done.wait [#allocation4], 128  }
 0x2b8   :  { %633 = vsyncadd [#allocation4], 4294967168 }
 0x2b9   :  { %394 = vsyncpa [#allocation3], 1 }
 0x2ba   :  { %395 = vsyncpa [#allocation4], 1 }

</bundles_post_ra>
